<compile_context>
chip_gen: v7x
topology: tpu7x:2x2x1
jax: 0.10.0
libtpu: 0.0.40
codegen_flags: <defaults>
</compile_context>

<pallas_src>
import functools
import math

import jax
import jax.numpy as jnp
from jax.experimental import pallas as pl
from jax.experimental.pallas import tpu as pltpu


def decoder_kernel(x_ref, wt_ref, out_ref):
    """One batch element: frames = W^T @ x on the MXU, then fused overlap-add.

    x_ref:   (1, N, I)   float32  -- separator output, channels-major (NCW)
    wt_ref:  (L, N)      bfloat16 -- ConvTranspose1d weight transposed: wt[k, n] = w[n, 0, k]
    out_ref: (1, S, I+1) float32  -- out_ref[0, r, j] = y[j * S + r],  S = L // 2
    """
    L = wt_ref.shape[0]
    S = L // 2
    x = x_ref[0].astype(jnp.bfloat16)                       # (N, I)
    wt = wt_ref[...]                                        # (L, N)
    # Per-frame synthesis: (L, N) @ (N, I) -> (L, I); frame axis I on lanes (lane-dense).
    ycol = jnp.dot(wt, x, preferred_element_type=jnp.float32)
    first = ycol[:S, :]     # tap k in [0, S)  -> sample t = i*S + k
    second = ycol[S:, :]    # tap k in [S, L)  -> sample t = (i+1)*S + (k - S)
    zcol = jnp.zeros((S, 1), jnp.float32)
    # Overlap-add (stride = L//2 => at most two overlapping frames per output sample):
    #   out2dT[r, j] = first[r, j]   for j < I
    #                + second[r, j-1] for j >= 1
    out_ref[0] = (jnp.concatenate([first, zcol], axis=1)
                  + jnp.concatenate([zcol, second], axis=1))


def decoder_forward(x, weight, *, L):
    """torch.nn.ConvTranspose1d(N, 1, L, stride=L//2, padding=0, bias=False).forward.

    x:      (B, N, I) float32
    weight: (N, 1, L) float32  (torch ConvTranspose1d weight layout)
    returns (B, 1, (I - 1) * (L // 2) + L) float32
    """
    assert L % 2 == 0, "sepformer decoder uses even L (stride = L // 2)"
    B, N, I = x.shape
    S = L // 2
    T_out = (I - 1) * S + L                                    # == (I + 1) * S
    wt = jnp.transpose(weight[:, 0, :]).astype(jnp.bfloat16)   # (L, N), cast once

    out2dT = pl.pallas_call(
        decoder_kernel,
        grid=(B,),
        in_specs=[pl.BlockSpec((1, N, I), lambda b: (b, 0, 0)),
                  pl.BlockSpec((L, N), lambda b: (0, 0))],
        out_specs=pl.BlockSpec((1, S, I + 1), lambda b: (b, 0, 0)),
        out_shape=jax.ShapeDtypeStruct((B, S, I + 1), jnp.float32),
        compiler_params=pltpu.CompilerParams(dimension_semantics=("parallel",)),
    )(x, wt)

    # Layout plumbing only: (B, S, I+1) -> (B, I+1, S) -> (B, 1, T_out) time-major.
    return jnp.transpose(out2dT, (0, 2, 1)).reshape(B, 1, T_out)


def decoder_reference(x, weight, L):
    """Pure-JAX f32 reference of the same ConvTranspose1d (for validation)."""
    B, N, I = x.shape
    S = L // 2
    T_out = (I - 1) * S + L
    w = weight[:, 0, :]                                        # (N, L)
    frames = jnp.einsum("bni,nl->bil", x, w)                   # (B, I, L)
    out = jnp.zeros((B, T_out), jnp.float32)
    out = out.at[:, 0:I * S].add(frames[:, :, :S].reshape(B, I * S))
    out = out.at[:, S:(I + 1) * S].add(frames[:, :, S:].reshape(B, I * S))
    return out[:, None, :]


if __name__ == "__main__":
    # Small shapes consistent with the module: B=2 batch, N=64 encoder channels,
    # L=16 filter length (stride 8), I=127 frames  ->  I+1 = 128 lanes, T_out = 1024.
    B, N, L, I = 2, 64, 16, 127

    key = jax.random.PRNGKey(0)
    kx, kw = jax.random.split(key)
    x = jax.random.normal(kx, (B, N, I), dtype=jnp.float32)
    weight = (jax.random.normal(kw, (N, 1, L), dtype=jnp.float32)
              / math.sqrt(N * L)).astype(jnp.float32)

    fwd = jax.jit(functools.partial(decoder_forward, L=L))
    y = jax.block_until_ready(fwd(x, weight))

    T_out = (I - 1) * (L // 2) + L
    assert y.shape == (B, 1, T_out), y.shape
    assert bool(jnp.all(jnp.isfinite(y)))

    # Validate against the f32 reference (generous tolerance: bf16 MXU operands).
    ref = decoder_reference(x, weight, L)
    max_err = float(jnp.max(jnp.abs(y - ref)))
    scale = float(jnp.max(jnp.abs(ref))) + 1e-6
    assert max_err / scale < 5e-2, (max_err, scale)

    print("KERNEL_OK")
</pallas_src>

<mosaic_0001>
module attributes {stable_mosaic.version = 11 : i64} {
  func.func @decoder_kernel(%arg0: i32, %arg1: memref<1x64x127xf32, #tpu.memory_space<vmem>>, %arg2: memref<16x64xbf16, #tpu.memory_space<vmem>>, %arg3: memref<1x8x128xf32, #tpu.memory_space<vmem>>) attributes {dimension_semantics = [#tpu.dimension_semantics<parallel>], iteration_bounds = array<i64: 2>, scalar_prefetch = 0 : i64, scratch_operands = 0 : i64, tpu.core_type = #tpu.core_type<tc>, window_params = [{transform_indices = @transform_0, window_bounds = array<i64: 1, 64, 127>}, {pipeline_mode = #tpu.pipeline_mode<synchronous>, transform_indices = @transform_1, window_bounds = array<i64: 16, 64>}, {transform_indices = @transform_2, window_bounds = array<i64: 1, 8, 128>}]} {
    %c0 = arith.constant 0 : index
    %c0_0 = arith.constant 0 : index
    %c0_1 = arith.constant 0 : index
    %0 = vector.load %arg1[%c0, %c0_0, %c0_1] : memref<1x64x127xf32, #tpu.memory_space<vmem>>, vector<1x64x127xf32>
    %1 = vector.shape_cast %0 : vector<1x64x127xf32> to vector<64x127xf32>
    %2 = arith.truncf %1 : vector<64x127xf32> to vector<64x127xbf16>
    %c0_2 = arith.constant 0 : index
    %c0_3 = arith.constant 0 : index
    %3 = vector.load %arg2[%c0_2, %c0_3] : memref<16x64xbf16, #tpu.memory_space<vmem>>, vector<16x64xbf16>
    %cst = arith.constant dense<0.000000e+00> : vector<16x127xf32>
    %4 = tpu.matmul %3, %2, %cst {dimension_numbers = #tpu.dot_dimension_numbers<[1], [0], [0], [1], [0, 0, 1, 1], [], []>} : vector<16x64xbf16>, vector<64x127xbf16>, vector<16x127xf32> -> vector<16x127xf32>
    %5 = vector.extract_strided_slice %4 {offsets = [0, 0], sizes = [8, 127], strides = [1, 1]} : vector<16x127xf32> to vector<8x127xf32>
    %6 = vector.extract_strided_slice %4 {offsets = [8, 0], sizes = [8, 127], strides = [1, 1]} : vector<16x127xf32> to vector<8x127xf32>
    %cst_4 = arith.constant 0.000000e+00 : f32
    %7 = vector.broadcast %cst_4 : f32 to vector<8x1xf32>
    %8 = tpu.concatenate %5, %7 in 1 : vector<8x127xf32>, vector<8x1xf32> -> vector<8x128xf32>
    %9 = tpu.concatenate %7, %6 in 1 : vector<8x1xf32>, vector<8x127xf32> -> vector<8x128xf32>
    %10 = arith.addf %8, %9 : vector<8x128xf32>
    %c0_5 = arith.constant 0 : index
    %c0_6 = arith.constant 0 : index
    %c0_7 = arith.constant 0 : index
    %11 = vector.load %arg3[%c0_5, %c0_6, %c0_7] : memref<1x8x128xf32, #tpu.memory_space<vmem>>, vector<1x8x128xf32>
    %12 = vector.shape_cast %11 : vector<1x8x128xf32> to vector<8x128xf32>
    %13 = vector.shape_cast %10 : vector<8x128xf32> to vector<1x8x128xf32>
    tpu.vector_store %arg3[%c0_5, %c0_6, %c0_7], %13 {strides = array<i32>} : memref<1x8x128xf32, #tpu.memory_space<vmem>>, vector<1x8x128xf32>,
    return
  }
  func.func @transform_0(%arg0: i32) -> (i32, i32, i32) {
    %c0_i32 = arith.constant 0 : i32
    %c0_i32_0 = arith.constant 0 : i32
    %c0_i32_1 = arith.constant 0 : i32
    return %arg0, %c0_i32, %c0_i32_0 : i32, i32, i32
  }
  func.func @transform_1(%arg0: i32) -> (i32, i32) {
    %c0_i32 = arith.constant 0 : i32
    %c0_i32_0 = arith.constant 0 : i32
    %c0_i32_1 = arith.constant 0 : i32
    return %c0_i32, %c0_i32_0 : i32, i32
  }
  func.func @transform_2(%arg0: i32) -> (i32, i32, i32) {
    %c0_i32 = arith.constant 0 : i32
    %c0_i32_0 = arith.constant 0 : i32
    %c0_i32_1 = arith.constant 0 : i32
    return %arg0, %c0_i32, %c0_i32_0 : i32, i32, i32
  }
}

</mosaic_0001>

<bundles_post_ra>
// kernel: decoder_forward.1
= control target key start
LH: loop header
LB: loop body
LE: loop exit
PB: predicated region body
PF: predicated region fallthrough
CT: control target
= control target key end

     0   :  { %7 = vsyncpa [#allocation3], 0  ;;  %s576_s0 = inlined_call_operand.hbm [shape: f32[2,64,127], index: 0, kind: input, shape index: {}]   ;;  %s577_s1 = inlined_call_operand.vmem [shape: bf16[16,64], index: 1, kind: input, shape index: {}]   ;;  %s578_s2 = inlined_call_operand.vmem [shape: f32[2,8,128], index: 2, kind: output, shape index: {}]  }
   0x1   :  { %9 = vsyncpa [#allocation3 + $0x1], 0  ;;  %s465_s9 = smov 0   ;;  %s467_s10 = smov 0  }
   0x2   :  { %s469_s11 = smov 0   ;;  %s471_s12 = smov 0  }
   0x3 LB: > { %s484_s13 = sadd.s32 4294967295, %s442_s12   ;;  %s487_s14 = sadd.s32 1, %s442_s12   ;;  %s442_s12 = sphi %s471_s12, %s585_s12   ;;  %s438_s11 = sphi %s469_s11, %s584_s11   ;;  %s434_s10 = sphi %s467_s10, %s583_s10   ;;  %s430_s9 = sphi %s465_s9, %s582_s9  }
   0x4   : > { %s19_s15 = ssub.s32 %s442_s12, %s487_s14  ;;  %s22_s16 = sadd.s32 1, %s438_s11 }
   0x5   : > { %p20_p0 = scmp.eq.s32.totalorder %s19_s15, 0  ;;  %p29_p1 = scmp.ne.s32.totalorder %s438_s11, %s434_s10 }
   0x6   : > { %p30_p2 = scmp.eq.s32.totalorder %s442_s12, 0  ;;  %p35_p3 = scmp.ne.s32.totalorder %s434_s10, %s430_s9 }
   0x7   : > { %s497_s17 = scalar_select %p20_p0, %s438_s11, %s22_s16  }
   0x8   : > { %p31_p4 = por %p30_p2, %p29_p1  ;;  %p36_p5 = scmp.eq.s32.totalorder %s484_s13, 0 }
   0x9   : > { %p339_p6 = scmp.lt.s32.totalorder %s442_s12, 2  ;;  %s109_s19 = sand.u32 1, %s438_s11  }
   0xa   : > { %p501_p7 = por %p36_p5, %p35_p3  ;;  %s305_s20 = sshll.u32 %s109_s19, 6 }
   0xb   : > { %s315_s21 = sshll.u32 %s442_s12, 10  ;;  %s113_s25 = scalar_lea.vmem [#allocation2], %s305_s20 }
   0xc   : > { %s510_s24 = scalar_lea.hbm %s576_s0, %s315_s21  ;;  %s120_s26 = sshll.u32 %s113_s25, 4  ;;  %s512_s26 = int_to_ptr.vmem [resolvable:$true] %s120_s26 }
   0xd   : > { %p514_p8 = pnand %p339_p6, %p31_p4  ;;  %s519_s28 = scalar_lea.sflag [#allocation3], %s109_s19 }
   0xe   : > { %s378_s29 = scalar_lea.hbm %s510_s24, 1024  ;;  %s383_s4 = scalar_lea.hbm %s576_s0, 2048 }
   0xf   : > { %p379_p10 = scmp.ne.s32.totalorder %s510_s24, %s378_s29  ;;  %p380_p11 = pneg %p514_p8 }
  0x10   : > { %p384_p0 = scmp.lt.u32.totalorder %s510_s24, %s576_s0  ;;  %p385_p1 = scmp.lt.u32.totalorder %s383_s4, %s378_s29 }
  0x11   : > { %p381_p12 = pnand %p380_p11, %p379_p10  ;;  %p387_p3 = scmp.lt.u32.totalorder %s378_s29, %s510_s24 }
  0x12   : > { %p386_p2 = por %p385_p1, %p384_p0 }
  0x13   : > { %p382_p13 = pneg %p381_p12 }
  0x14   : > { %p388_p4 = por %p387_p3, %p386_p2 }
  0x16   : > { %p389_p5 = pnand %p388_p4, %p382_p13 }
  0x18   : > { %392 = shalt.err (!%p389_p5)
}
  0x19   : > { %s393_s7 = scalar_lea.vmem %s512_s26, 1024  ;;  %s444_s8 = smov [#allocation2]  }
  0x1a   : > { %p394_p6 = scmp.ne.s32.totalorder %s512_s26, %s393_s7  ;;  %s398_s9 = sshll.u32 %s444_s8, 4  ;;  %s399_s9 = int_to_ptr.vmem [resolvable:$false] %s398_s9 }
  0x1b   : > { %s400_s15 = scalar_lea.vmem %s399_s9, 2048  ;;  %p401_p9 = scmp.lt.s32.totalorder %s512_s26, %s399_s9 }
  0x1c   : > { %p396_p10 = pnand %p394_p6, %p380_p11  ;;  %p402_p0 = scmp.lt.s32.totalorder %s400_s15, %s393_s7 }
  0x1e   : > { %p397_p12 = pneg %p396_p10  ;;  %p403_p1 = por %p402_p0, %p401_p9 }
  0x20   : > { %p404_p2 = pnand %p403_p1, %p397_p12 }
  0x22   : > { %407 = shalt.err (!%p404_p2)
}
  0x23   : > { %s445_s16 = smov 128   ;;  %s446_s19 = smov 8  }
  0x24   : > { %338 = dma.hbm_to_vmem [thread:$0]  (!%p514_p8), %s510_s24, 1024, %s512_s26, %s519_s28, %s445_s16, %s445_s16, %s446_s19  }
  0x25   : > { %p128_p11 = scmp.lt.s32.totalorder %s442_s12, 3  ;;  %p581_p13 = scmp.ge.s32.totalorder %s442_s12, 1 }
  0x27   : > { %p129_p3 = pnand %p581_p13, %p128_p11 }
  0x28   : > { %s134_s20 = sand.u32 (!%p129_p3), 1, %s434_s10  }
  0x29   : > { %132 = sbr.rel (%p129_p3) target bundleno = 400 (0x190), region = 28  ;;  %s309_s21 = sshll.u32 (!%p129_p3), %s134_s20, 6 }
  0x2a   : > { %s135_s22 = scalar_lea.sflag (!%p129_p3), [#allocation3], %s134_s20  ;;  %s138_s23 = scalar_lea.vmem (!%p129_p3), [#allocation2], %s309_s21 }
  0x30   : > { %425 = dma.done.wait (%p501_p7), %s135_s22, 1024  }
  0x31   : > { %427 = vsyncadd (%p501_p7), %s135_s22, 4294966272  ;;  %v447_v0 = vmov 0.0   ;;  %vm448_vm0 = vmmov 0   ;;  %v163_v1 = vld [vmem:[%s138_s23] sm:$0xff]  ;;  %v164_v2 = vld [vmem:[%s138_s23 + $0x8] sm:$0xff]  ;;  %vm182_vm1 = vcmask 523264  }
  0x32   : > { %321 = vmatprep.subr.bf16.mxu0 %v447_v0  ;;  %329 = vmatprep.mubr.msk.bf16.mxu0 %vm448_vm0, %v447_v0  ;;  %v165_v3 = vld [vmem:[%s138_s23 + $0x10] sm:$0xff]  ;;  %v171_v4 = vpack.c.bf16 %v164_v2, %v163_v1  ;;  %v166_v5 = vld [vmem:[%s138_s23 + $0x18] sm:$0xff]  ;;  %v167_v7 = vld [vmem:[%s138_s23 + $0x20] sm:$0xff]  ;;  %s449_s24 = smov 1   ;;  %p158_p7 = scmp.lt.s32.totalorder %s484_s13, 1  ;;  %vm227_vm2 = vcmask 1039360  }
  0x33   : > { %v172_v6 = vpack.c.bf16 %v166_v5, %v165_v3  ;;  %v168_v8 = vld [vmem:[%s138_s23 + $0x28] sm:$0xff]  ;;  %v169_v10 = vld [vmem:[%s138_s23 + $0x30] sm:$0xff]  ;;  %v170_v11 = vld [vmem:[%s138_s23 + $0x38] sm:$0xff]  ;;  %vm233_vm3 = vcmask 7168  }
  0x34   : > { %322 = vmatpush3.bf16.msra.mxu0 %v171_v4  ;;  %v173_v9 = vpack.c.bf16 %v168_v8, %v167_v7  ;;  %v174_v12 = vpack.c.bf16 %v170_v11, %v169_v10  ;;  %v377_v13 = vld [vmem:[%s577_s1] sm:$0xff]   ;;  %s587_s13 = smov (!%p158_p7, %s484_s13), 1 }
  0x35   : > { %323 = vmatprep.subr.bf16.mxu0 %v447_v0  ;;  %s310_s25 = sshll.u32 %s587_s13, 3 }
  0x36   : > { %s161_s28 = scalar_lea.vmem %s578_s2, %s310_s25 }
  0x38   : > { %324 = vmatpush3.bf16.msra.mxu0 %v172_v6 }
  0x39   : > { %325 = vmatprep.subr.bf16.mxu0 %v447_v0 }
  0x3c   : > { %326 = vmatpush3.bf16.msra.mxu0 %v173_v9 }
  0x3d   : > { %327 = vmatprep.subr.bf16.mxu0 %v447_v0 }
  0x40   : > { %328 = vmatpush3.bf16.msra.mxu0 %v174_v12 }
  0x43   : > { %330 = vmatmul.mubr.msk.bf16.vlgmr.msra.gmra.mrb[0].mxu0 %vm182_vm1, %v377_v13 }
 0x116   : > { %v220_v14 = vpop.f32.mrb[0].mxu0 }
 0x117   : > { %v331_v15 = vpop.f32.mrb[1].mxu0  ;;  %v228_v19 = vsel %vm227_vm2, %v220_v14, 0.0 }
 0x118   : > { %v223_v16 = vpop.f32.mrb[2].mxu0 }
 0x119   : > { %v332_v17 = vpop.f32.mrb[3].mxu0  ;;  %230 = vrot.lane.b32.xlu0 %v223_v16, %s449_s24 }
 0x18b   : > { %v231_v18 = vpop.permute.xlu0 %230 }
 0x18c   : > { %v234_v20 = vsel %vm233_vm3, 0.0, %v231_v18 }
 0x18d   : > { %v235_v21 = vadd.f32 %v234_v20, %v228_v19 }
 0x18f   : > { %236 = vst [vmem:[%s161_s28] sm:$0xff] %v235_v21 }
 0x190 PF: > { %p12_p8 = scmp.ge.s32.totalorder %s487_s14, 4   ;;  %s582_s9 = smov %s434_s10 }
 0x191   : > { %s583_s10 = smov %s438_s11  ;;  %s584_s11 = smov %s497_s17 }
 0x192   : > { %s585_s12 = smov %s487_s14  ;;  %14 = sbr.rel (!%p12_p8) target bundleno = 3 (0x3), region = 68 }
 0x199   :  { %256 = vsyncpa [#allocation3], 1 }
 0x19a   :  { %258 = vsyncpa [#allocation3 + $0x1], 1 }

</bundles_post_ra>
